<compile_context>
chip_gen: v5e
topology: v5e:2x2
jax: 0.10.0
libtpu: 0.0.40
codegen_flags: <defaults>
</compile_context>

<pallas_src>
import jax
import jax.numpy as jnp
from jax.experimental import pallas as pl
from jax.experimental.pallas import tpu as pltpu

_LANES = 128


def _round_up(x: int, m: int) -> int:
    return ((x + m - 1) // m) * m


def meta_mlp_kernel(bp_ref, feat_ref, w1bp_ref, w1f_ref, b1_ref,
                    w2_ref, b2_ref, w3p_ref, b3p_ref, o_ref):
    """Fused MLP: (fused concat) -> Linear -> ReLU -> Linear -> ReLU -> Linear."""
    cdt = w2_ref.dtype  # MXU input dtype (f32 or bf16 depending on param storage)

    # Layer 1, with the concat folded in:
    #   [base_pred, feat] @ W1 = feat @ W1[1:, :] + base_pred * W1[0:1, :]
    h1 = jnp.dot(feat_ref[...].astype(cdt), w1f_ref[...],
                 preferred_element_type=jnp.float32)                  # (TB, H)
    h1 += bp_ref[...].astype(jnp.float32) * w1bp_ref[...].astype(jnp.float32)
    h1 = jnp.maximum(h1 + b1_ref[...].astype(jnp.float32), 0.0)

    # Layer 2.
    h2 = jnp.dot(h1.astype(cdt), w2_ref[...],
                 preferred_element_type=jnp.float32)                  # (TB, H)
    h2 = jnp.maximum(h2 + b2_ref[...].astype(jnp.float32), 0.0)

    # Output head, padded to 128 lanes (column 0 holds the real result) so the
    # store is a full, unmasked vst.
    out = jnp.dot(h2.astype(cdt), w3p_ref[...],
                  preferred_element_type=jnp.float32)                 # (TB, 128)
    o_ref[...] = (out + b3p_ref[...].astype(jnp.float32)).astype(o_ref.dtype)


def meta_mlp_forward(base_pred, features, params, *, block_batch: int = 512):
    """base_pred: (B, 1), features: (B, input_size - 1) -> (B, 1)."""
    w1, b1, w2, b2, w3, b3 = params
    B = base_pred.shape[0]
    F = features.shape[1]
    H = w1.shape[1]
    pdt = w1.dtype

    # Split W1 so the concatenation is fused into the kernel.
    w1_bp = w1[:1, :]    # (1, H)  — row that multiplies the base_pred column
    w1_feat = w1[1:, :]  # (F, H)

    # Pad the output head to a lane-dense width (unmasked stores in-kernel).
    w3p = jnp.zeros((H, _LANES), pdt).at[:, :1].set(w3)
    b3p = jnp.zeros((1, _LANES), pdt).at[:, :1].set(b3)

    # Batch tiling (pad B up to a multiple of the tile so every block is full).
    TB = _round_up(min(block_batch, _round_up(B, 8)), 8)
    Bp = _round_up(B, TB)
    if Bp != B:
        pad = Bp - B
        base_pred = jnp.pad(base_pred, ((0, pad), (0, 0)))
        features = jnp.pad(features, ((0, pad), (0, 0)))

    grid = (Bp // TB,)

    # Batch-tiled specs for the activation stream; constant-index specs for the
    # weights/biases so they are fetched once and stay VMEM-resident.
    row = lambda shape: pl.BlockSpec(shape, lambda i: (i, 0))
    rep = lambda shape: pl.BlockSpec(shape, lambda i: (0, 0))

    out = pl.pallas_call(
        meta_mlp_kernel,
        out_shape=jax.ShapeDtypeStruct((Bp, _LANES), jnp.float32),
        grid=grid,
        in_specs=[
            row((TB, 1)),          # base_pred
            row((TB, F)),          # features
            rep((1, H)),           # W1 row for base_pred
            rep((F, H)),           # W1 rows for features
            rep((1, H)),           # b1
            rep((H, H)),           # W2
            rep((1, H)),           # b2
            rep((H, _LANES)),      # W3 (lane-padded)
            rep((1, _LANES)),      # b3 (lane-padded)
        ],
        out_specs=row((TB, _LANES)),
        compiler_params=pltpu.CompilerParams(
            dimension_semantics=("parallel",),
            vmem_limit_bytes=32 * 1024 * 1024,
        ),
    )(base_pred, features, w1_bp, w1_feat, b1, w2, b2, w3p, b3p)

    # Wrapper-side slice: column 0 of the lane-dense slab, unpadded batch.
    return out[:B, :1]


def init_params(key, input_size, hidden_size, dtype=jnp.float32):
    """Deterministic parameter init mimicking PyTorch Linear default
    (uniform(-1/sqrt(fan_in), 1/sqrt(fan_in))). Weights stored (in, out)."""
    ks = jax.random.split(key, 6)

    def lin(kw, kb, fan_in, fan_out):
        bound = 1.0 / jnp.sqrt(fan_in)
        w = jax.random.uniform(kw, (fan_in, fan_out), jnp.float32, -bound, bound)
        b = jax.random.uniform(kb, (1, fan_out), jnp.float32, -bound, bound)
        return w.astype(dtype), b.astype(dtype)

    w1, b1 = lin(ks[0], ks[1], input_size, hidden_size)
    w2, b2 = lin(ks[2], ks[3], hidden_size, hidden_size)
    w3, b3 = lin(ks[4], ks[5], hidden_size, 1)
    return (w1, b1, w2, b2, w3, b3)


if __name__ == "__main__":
    key = jax.random.PRNGKey(0)
    k_bp, k_feat, k_params = jax.random.split(key, 3)

    # Small shapes: batch=256 (2 grid steps at TB=128),
    # input_size=8 (1 base_pred col + 7 feature cols), hidden=32.
    B = 256
    input_size = 8
    hidden_size = 32

    base_pred = jax.random.normal(k_bp, (B, 1), jnp.float32)
    features = jax.random.normal(k_feat, (B, input_size - 1), jnp.float32)
    params = init_params(k_params, input_size, hidden_size)

    out = meta_mlp_forward(base_pred, features, params, block_batch=128)
    jax.block_until_ready(out)

    # Pure-JAX reference check of the fused kernel.
    x = jnp.concatenate([base_pred, features], axis=1)
    w1, b1, w2, b2, w3, b3 = params
    ref = jnp.maximum(x @ w1 + b1, 0.0)
    ref = jnp.maximum(ref @ w2 + b2, 0.0)
    ref = ref @ w3 + b3
    assert out.shape == (B, 1)
    assert jnp.allclose(out, ref, atol=1e-5, rtol=1e-5)

    print("KERNEL_OK")
</pallas_src>

<mosaic_0001>
module attributes {stable_mosaic.version = 11 : i64} {
  func.func @meta_mlp_kernel(%arg0: i32, %arg1: memref<128x1xf32, #tpu.memory_space<vmem>>, %arg2: memref<128x7xf32, #tpu.memory_space<vmem>>, %arg3: memref<1x32xf32, #tpu.memory_space<vmem>>, %arg4: memref<7x32xf32, #tpu.memory_space<vmem>>, %arg5: memref<1x32xf32, #tpu.memory_space<vmem>>, %arg6: memref<32x32xf32, #tpu.memory_space<vmem>>, %arg7: memref<1x32xf32, #tpu.memory_space<vmem>>, %arg8: memref<32x128xf32, #tpu.memory_space<vmem>>, %arg9: memref<1x128xf32, #tpu.memory_space<vmem>>, %arg10: memref<128x128xf32, #tpu.memory_space<vmem>>) attributes {dimension_semantics = [#tpu.dimension_semantics<parallel>], iteration_bounds = array<i64: 2>, scalar_prefetch = 0 : i64, scratch_operands = 0 : i64, tpu.core_type = #tpu.core_type<tc>, window_params = [{transform_indices = @transform_0, window_bounds = array<i64: 128, 1>}, {transform_indices = @transform_1, window_bounds = array<i64: 128, 7>}, {pipeline_mode = #tpu.pipeline_mode<synchronous>, transform_indices = @transform_2, window_bounds = array<i64: 1, 32>}, {pipeline_mode = #tpu.pipeline_mode<synchronous>, transform_indices = @transform_3, window_bounds = array<i64: 7, 32>}, {pipeline_mode = #tpu.pipeline_mode<synchronous>, transform_indices = @transform_4, window_bounds = array<i64: 1, 32>}, {pipeline_mode = #tpu.pipeline_mode<synchronous>, transform_indices = @transform_5, window_bounds = array<i64: 32, 32>}, {pipeline_mode = #tpu.pipeline_mode<synchronous>, transform_indices = @transform_6, window_bounds = array<i64: 1, 32>}, {pipeline_mode = #tpu.pipeline_mode<synchronous>, transform_indices = @transform_7, window_bounds = array<i64: 32, 128>}, {pipeline_mode = #tpu.pipeline_mode<synchronous>, transform_indices = @transform_8, window_bounds = array<i64: 1, 128>}, {transform_indices = @transform_9, window_bounds = array<i64: 128, 128>}]} {
    %c0 = arith.constant 0 : index
    %c0_0 = arith.constant 0 : index
    %0 = vector.load %arg2[%c0, %c0_0] : memref<128x7xf32, #tpu.memory_space<vmem>>, vector<128x7xf32>
    %c0_1 = arith.constant 0 : index
    %c0_2 = arith.constant 0 : index
    %1 = vector.load %arg4[%c0_1, %c0_2] : memref<7x32xf32, #tpu.memory_space<vmem>>, vector<7x32xf32>
    %cst = arith.constant dense<0.000000e+00> : vector<128x32xf32>
    %2 = tpu.matmul %0, %1, %cst {dimension_numbers = #tpu.dot_dimension_numbers<[1], [0], [0], [1], [0, 0, 1, 1], [], []>} : vector<128x7xf32>, vector<7x32xf32>, vector<128x32xf32> -> vector<128x32xf32>
    %c0_3 = arith.constant 0 : index
    %c0_4 = arith.constant 0 : index
    %3 = vector.load %arg1[%c0_3, %c0_4] : memref<128x1xf32, #tpu.memory_space<vmem>>, vector<128x1xf32>
    %c0_5 = arith.constant 0 : index
    %c0_6 = arith.constant 0 : index
    %4 = vector.load %arg3[%c0_5, %c0_6] : memref<1x32xf32, #tpu.memory_space<vmem>>, vector<1x32xf32>
    %5 = vector.broadcast %3 : vector<128x1xf32> to vector<128x32xf32>
    %6 = vector.broadcast %4 : vector<1x32xf32> to vector<128x32xf32>
    %7 = arith.mulf %5, %6 : vector<128x32xf32>
    %8 = arith.addf %2, %7 : vector<128x32xf32>
    %c0_7 = arith.constant 0 : index
    %c0_8 = arith.constant 0 : index
    %9 = vector.load %arg5[%c0_7, %c0_8] : memref<1x32xf32, #tpu.memory_space<vmem>>, vector<1x32xf32>
    %10 = vector.broadcast %9 : vector<1x32xf32> to vector<128x32xf32>
    %11 = arith.addf %8, %10 : vector<128x32xf32>
    %cst_9 = arith.constant 0.000000e+00 : f32
    %12 = vector.broadcast %cst_9 : f32 to vector<128x32xf32>
    %13 = arith.maximumf %11, %12 : vector<128x32xf32>
    %c0_10 = arith.constant 0 : index
    %c0_11 = arith.constant 0 : index
    %14 = vector.load %arg6[%c0_10, %c0_11] : memref<32x32xf32, #tpu.memory_space<vmem>>, vector<32x32xf32>
    %cst_12 = arith.constant dense<0.000000e+00> : vector<128x32xf32>
    %15 = tpu.matmul %13, %14, %cst_12 {dimension_numbers = #tpu.dot_dimension_numbers<[1], [0], [0], [1], [0, 0, 1, 1], [], []>} : vector<128x32xf32>, vector<32x32xf32>, vector<128x32xf32> -> vector<128x32xf32>
    %c0_13 = arith.constant 0 : index
    %c0_14 = arith.constant 0 : index
    %16 = vector.load %arg7[%c0_13, %c0_14] : memref<1x32xf32, #tpu.memory_space<vmem>>, vector<1x32xf32>
    %17 = vector.broadcast %16 : vector<1x32xf32> to vector<128x32xf32>
    %18 = arith.addf %15, %17 : vector<128x32xf32>
    %cst_15 = arith.constant 0.000000e+00 : f32
    %19 = vector.broadcast %cst_15 : f32 to vector<128x32xf32>
    %20 = arith.maximumf %18, %19 : vector<128x32xf32>
    %c0_16 = arith.constant 0 : index
    %c0_17 = arith.constant 0 : index
    %21 = vector.load %arg8[%c0_16, %c0_17] : memref<32x128xf32, #tpu.memory_space<vmem>>, vector<32x128xf32>
    %cst_18 = arith.constant dense<0.000000e+00> : vector<128x128xf32>
    %22 = tpu.matmul %20, %21, %cst_18 {dimension_numbers = #tpu.dot_dimension_numbers<[1], [0], [0], [1], [0, 0, 1, 1], [], []>} : vector<128x32xf32>, vector<32x128xf32>, vector<128x128xf32> -> vector<128x128xf32>
    %c0_19 = arith.constant 0 : index
    %c0_20 = arith.constant 0 : index
    %23 = vector.load %arg9[%c0_19, %c0_20] : memref<1x128xf32, #tpu.memory_space<vmem>>, vector<1x128xf32>
    %24 = vector.broadcast %23 : vector<1x128xf32> to vector<128x128xf32>
    %25 = arith.addf %22, %24 : vector<128x128xf32>
    %c0_21 = arith.constant 0 : index
    %c0_22 = arith.constant 0 : index
    %26 = vector.load %arg10[%c0_21, %c0_22] : memref<128x128xf32, #tpu.memory_space<vmem>>, vector<128x128xf32>
    tpu.vector_store %arg10[%c0_21, %c0_22], %25 {strides = array<i32>} : memref<128x128xf32, #tpu.memory_space<vmem>>, vector<128x128xf32>,
    return
  }
  func.func @transform_0(%arg0: i32) -> (i32, i32) {
    %c0_i32 = arith.constant 0 : i32
    %c0_i32_0 = arith.constant 0 : i32
    return %arg0, %c0_i32 : i32, i32
  }
  func.func @transform_1(%arg0: i32) -> (i32, i32) {
    %c0_i32 = arith.constant 0 : i32
    %c0_i32_0 = arith.constant 0 : i32
    return %arg0, %c0_i32 : i32, i32
  }
  func.func @transform_2(%arg0: i32) -> (i32, i32) {
    %c0_i32 = arith.constant 0 : i32
    %c0_i32_0 = arith.constant 0 : i32
    %c0_i32_1 = arith.constant 0 : i32
    return %c0_i32, %c0_i32_0 : i32, i32
  }
  func.func @transform_3(%arg0: i32) -> (i32, i32) {
    %c0_i32 = arith.constant 0 : i32
    %c0_i32_0 = arith.constant 0 : i32
    %c0_i32_1 = arith.constant 0 : i32
    return %c0_i32, %c0_i32_0 : i32, i32
  }
  func.func @transform_4(%arg0: i32) -> (i32, i32) {
    %c0_i32 = arith.constant 0 : i32
    %c0_i32_0 = arith.constant 0 : i32
    %c0_i32_1 = arith.constant 0 : i32
    return %c0_i32, %c0_i32_0 : i32, i32
  }
  func.func @transform_5(%arg0: i32) -> (i32, i32) {
    %c0_i32 = arith.constant 0 : i32
    %c0_i32_0 = arith.constant 0 : i32
    %c0_i32_1 = arith.constant 0 : i32
    return %c0_i32, %c0_i32_0 : i32, i32
  }
  func.func @transform_6(%arg0: i32) -> (i32, i32) {
    %c0_i32 = arith.constant 0 : i32
    %c0_i32_0 = arith.constant 0 : i32
    %c0_i32_1 = arith.constant 0 : i32
    return %c0_i32, %c0_i32_0 : i32, i32
  }
  func.func @transform_7(%arg0: i32) -> (i32, i32) {
    %c0_i32 = arith.constant 0 : i32
    %c0_i32_0 = arith.constant 0 : i32
    %c0_i32_1 = arith.constant 0 : i32
    return %c0_i32, %c0_i32_0 : i32, i32
  }
  func.func @transform_8(%arg0: i32) -> (i32, i32) {
    %c0_i32 = arith.constant 0 : i32
    %c0_i32_0 = arith.constant 0 : i32
    %c0_i32_1 = arith.constant 0 : i32
    return %c0_i32, %c0_i32_0 : i32, i32
  }
  func.func @transform_9(%arg0: i32) -> (i32, i32) {
    %c0_i32 = arith.constant 0 : i32
    %c0_i32_0 = arith.constant 0 : i32
    return %arg0, %c0_i32 : i32, i32
  }
}

</mosaic_0001>

<bundles_post_ra>
// kernel: tpu_custom_call.1
= control target key start
LH: loop header
LB: loop body
LE: loop exit
PB: predicated region body
PF: predicated region fallthrough
CT: control target
= control target key end

     0   :  { %14 = vsyncpa [#allocation3], 0  ;;  %s1516_s0 = inlined_call_operand.vmem [shape: f32[256,1], index: 0, kind: input, shape index: {}]   ;;  %s1517_s1 = inlined_call_operand.vmem [shape: f32[256,7], index: 1, kind: input, shape index: {}]   ;;  %s1518_s2 = inlined_call_operand.vmem [shape: f32[1,32], index: 2, kind: input, shape index: {}]   ;;  %s1519_s3 = inlined_call_operand.vmem [shape: f32[7,32], index: 3, kind: input, shape index: {}]   ;;  %s1520_s4 = inlined_call_operand.vmem [shape: f32[1,32], index: 4, kind: input, shape index: {}]   ;;  %s1521_s5 = inlined_call_operand.vmem [shape: f32[32,32], index: 5, kind: input, shape index: {}]   ;;  %s1522_s6 = inlined_call_operand.vmem [shape: f32[1,32], index: 6, kind: input, shape index: {}]   ;;  %s1523_s7 = inlined_call_operand.vmem [shape: f32[32,128], index: 7, kind: input, shape index: {}]   ;;  %s1524_s8 = inlined_call_operand.vmem [shape: f32[1,128], index: 8, kind: input, shape index: {}]   ;;  %s1525_s9 = inlined_call_operand.hbm [shape: f32[256,128], index: 9, kind: output, shape index: {}]  }
   0x1   :  { %16 = vsyncpa [#allocation3 + $0x1], 0  ;;  %s1247_s30 = smov 0   ;;  %s1249_s10 = smov 0  }
   0x2   :  { %s1251_s11 = smov 0   ;;  %s1253_s12 = smov 0  }
   0x3 LB: > { %s1268_s13 = sadd.s32 4294967295, %s1192_s12   ;;  %s1008_s14 = sadd.s32 4294967294, %s1192_s12   ;;  %s1192_s12 = sphi %s1253_s12, %s1531_s12   ;;  %s1188_s11 = sphi %s1251_s11, %s1530_s11   ;;  %s1184_s10 = sphi %s1249_s10, %s1529_s10   ;;  %s1180_s30 = sphi %s1247_s30, %s1528_s30  }
   0x4   : > { %s1272_s15 = sadd.s32 1, %s1192_s12   ;;  %s228_s16 = sadd.s32 1, %s1188_s11 }
   0x5   : > { %s225_s17 = ssub.s32 %s1192_s12, %s1272_s15  ;;  %p238_p0 = scmp.ne.s32.totalorder %s1188_s11, %s1184_s10 }
   0x6   : > { %p226_p1 = scmp.eq.s32.totalorder %s225_s17, 0  ;;  %p239_p2 = scmp.eq.s32.totalorder %s1268_s13, 1 }
   0x7   : > { %p244_p3 = scmp.ne.s32.totalorder %s1184_s10, %s1180_s30  ;;  %p245_p4 = scmp.eq.s32.totalorder %s1008_s14, 1 }
   0x8   : > { %s1283_s18 = scalar_select %p226_p1, %s1188_s11, %s228_s16  }
   0x9   : > { %p1285_p5 = por %p239_p2, %p238_p0  ;;  %p1289_p6 = por %p245_p4, %p244_p3 }
   0xa   : > { %p1011_p7 = scmp.ge.s32.totalorder %s1192_s12, 1  ;;  %p302_p8 = scmp.lt.s32.totalorder %s1192_s12, 3 }
   0xc   : > { %p303_p9 = pnand %p1011_p7, %p302_p8 }
   0xd   : > { %s1013_s23 = sshll.u32 (!%p303_p9), %s1268_s13, 4  ;;  %s340_s29 = sand.u32 (!%p303_p9), 1, %s1184_s10  }
   0xe   : > { %306 = sbr.rel (%p303_p9) target bundleno = 549 (0x225), region = 56  ;;  %p344_p10 = scmp.lt.s32.totalorder (!%p303_p9), %s1013_s23, 31 }
   0xf   : > { %s1071_s22 = sshll.u32 (!%p303_p9), %s1268_s13, 7  ;;  %s919_s28 = scalar_lea.sflag (!%p303_p9), [#allocation3], %s340_s29 }
  0x10   : > { %s930_s25 = scalar_lea.hbm (!%p303_p9), %s1525_s9, %s1071_s22  ;;  %s1150_s22 = scalar_lea.hbm (!%p303_p9), %s1525_s9, 256 }
  0x13   : > { %v372_v0 = vld [vmem:[%s1519_s3] sm:$0x7f]  ;;  %vm538_vm0 = vcmask 1046528   ;;  %v1194_v1 = vmov 0   ;;  %s1533_s23 = smov (!%p344_p10, %s1013_s23), 31  ;;  %vm489_vm1 = vcmask 56320  }
  0x14   : > { %1017 = vmatpush.msk.msra.mxu0 %vm538_vm0, %v372_v0  ;;  %1123 = vset.pattern.permute.xlu0 %v1194_v1  ;;  %s1014_s24 = sshll.u32 %s1533_s23, 3  ;;  %v646_v33 = vld [vmem:[%s1521_s5 + $0x18] sm:$0xff]  ;;  %v645_v35 = vld [vmem:[%s1521_s5 + $0x10] sm:$0xff]  ;;  %v644_v36 = vld [vmem:[%s1521_s5 + $0x8] sm:$0xff]  ;;  %vm651_vm2 = vcmask 261120  }
  0x15   : > { %1072 = vmatpush.msk.msra.mxu3 %vm538_vm0, %v372_v0  ;;  %1124 = vset.pattern.permute.xlu1 %v1194_v1  ;;  %s1302_s27 = scalar_lea.vmem %s1517_s1, %s1014_s24  ;;  %s1307_s14 = scalar_lea.vmem %s1516_s0, %s1014_s24  ;;  %v643_v37 = vld [vmem:[%s1521_s5] sm:$0xff] }
  0x16   : > { %1125 = vset.pattern.permute.xlu2 %v1194_v1  ;;  %v356_v2 = vld [vmem:[%s1302_s27] sm:$0xff]  ;;  %v369_v4 = vld [vmem:[%s1302_s27 + $0x68] sm:$0xff]  ;;  %v375_v5 = vld [vmem:[%s1307_s14 + $0x10] sm:$0xff]  ;;  %712 = vmatpush.msra.mxu1 %v646_v33 }
  0x17   : > { %v373_v3 = vld [vmem:[%s1307_s14] sm:$0xff]  ;;  %1018 = vmatmul.msk.f32.vlgmr.msra.gmra.mxu0 %vm489_vm1, %v356_v2  ;;  %1031 = vmatmul.msk.f32.vlgmr.msra.gmra.mxu3 %vm489_vm1, %v369_v4  ;;  %v357_v6 = vld [vmem:[%s1302_s27 + $0x8] sm:$0xff]  ;;  %v370_v8 = vld [vmem:[%s1302_s27 + $0x70] sm:$0xff] }
  0x18   : > { %392 = vperm.xlu0 %1123, %v373_v3   ;;  %402 = vperm.xlu1 %1124, %v375_v5   ;;  %v374_v7 = vld [vmem:[%s1307_s14 + $0x8] sm:$0xff]  ;;  %v376_v9 = vld [vmem:[%s1307_s14 + $0x18] sm:$0xff]  ;;  %v358_v10 = vld [vmem:[%s1302_s27 + $0x10] sm:$0xff] }
  0x19   : > { %v379_v11 = vld [vmem:[%s1307_s14 + $0x30] sm:$0xff]  ;;  %v380_v12 = vld [vmem:[%s1307_s14 + $0x38] sm:$0xff]  ;;  %v381_v14 = vld [vmem:[%s1307_s14 + $0x40] sm:$0xff]  ;;  %1073 = vmatpush.msrb.mxu3 %v646_v33  ;;  %713 = vmatpush.msra.mxu1 %v645_v35 }
  0x1a   : > { %v359_v13 = vld [vmem:[%s1302_s27 + $0x18] sm:$0xff]  ;;  %v386_v15 = vld [vmem:[%s1307_s14 + $0x68] sm:$0xff]  ;;  %v360_v16 = vld [vmem:[%s1302_s27 + $0x20] sm:$0xff] }
  0x1b   : > { %v387_v17 = vld [vmem:[%s1307_s14 + $0x70] sm:$0xff]  ;;  %v371_v19 = vld [vmem:[%s1302_s27 + $0x78] sm:$0xff]  ;;  %v377_v20 = vld [vmem:[%s1307_s14 + $0x20] sm:$0xff]  ;;  %1074 = vmatpush.msrb.mxu3 %v645_v35  ;;  %714 = vmatpush.msra.mxu1 %v644_v36 }
  0x1c   : > { %v383_v18 = vld [vmem:[%s1307_s14 + $0x50] sm:$0xff]  ;;  %412 = vperm.xlu2 %1125, %v377_v20   ;;  %v361_v21 = vld [vmem:[%s1302_s27 + $0x28] sm:$0xff]  ;;  %v384_v22 = vld [vmem:[%s1307_s14 + $0x58] sm:$0xff] }
  0x1d   : > { %v378_v23 = vld [vmem:[%s1307_s14 + $0x28] sm:$0xff]  ;;  %v362_v24 = vld [vmem:[%s1302_s27 + $0x30] sm:$0xff]  ;;  %v385_v25 = vld [vmem:[%s1307_s14 + $0x60] sm:$0xff]  ;;  %1075 = vmatpush.msrb.mxu3 %v644_v36  ;;  %715 = vmatpush.msra.mxu1 %v643_v37 }
  0x1e   : > { %v363_v26 = vld [vmem:[%s1302_s27 + $0x38] sm:$0xff]  ;;  %v382_v27 = vld [vmem:[%s1307_s14 + $0x48] sm:$0xff]  ;;  %v364_v28 = vld [vmem:[%s1302_s27 + $0x40] sm:$0xff] }
  0x1f   : > { %1019 = vmatmul.msk.f32.gmra.mxu0 %vm489_vm1, %v357_v6  ;;  %1032 = vmatmul.msk.f32.gmra.mxu3 %vm489_vm1, %v370_v8  ;;  %v388_v29 = vld [vmem:[%s1307_s14 + $0x78] sm:$0xff]  ;;  %v365_v30 = vld [vmem:[%s1302_s27 + $0x48] sm:$0xff]  ;;  %v366_v31 = vld [vmem:[%s1302_s27 + $0x50] sm:$0xff]  ;;  %s1012_s14 = sshll.u32 %s340_s29, 7 }
  0x20   : > { %397 = vperm.xlu0 %1123, %v374_v7   ;;  %407 = vperm.xlu1 %1124, %v376_v9   ;;  %v367_v32 = vld [vmem:[%s1302_s27 + $0x58] sm:$0xff]  ;;  %v368_v34 = vld [vmem:[%s1302_s27 + $0x60] sm:$0xff]  ;;  %s1464_s21 = scalar_lea.vmem [#allocation2], %s1012_s14  ;;  %s933_s27 = sshll.u32 %s930_s25, 4  ;;  %s934_s27 = int_to_ptr.hbm [resolvable:$true] %s933_s27 }
  0x21   : > { %1076 = vmatpush.msrb.mxu3 %v643_v37  ;;  %v1372_v38 = vld [vmem:[%s1518_s2] ss:$0 sm:$0xff]  ;;  %s931_s26 = sshll.u32 %s1464_s21, 4  ;;  %s1144_s14 = sshra.s32 %s934_s27, 4  ;;  %s932_s26 = int_to_ptr.vmem [resolvable:$true] %s931_s26  ;;  %s1145_s14 = int_to_ptr.hbm [resolvable:$true] %s1144_s14 }
  0x22   : > { %v1378_v41 = vld [vmem:[%s1520_s4] ss:$0 sm:$0xff]  ;;  %s1146_s13 = scalar_lea.hbm %s1145_s14, 128  ;;  %p1151_p0 = scmp.lt.s32.totalorder %s1145_s14, %s1525_s9 }
  0x23   : > { %p1147_p11 = scmp.ne.s32.totalorder %s1145_s14, %s1146_s13  ;;  %p1152_p1 = scmp.lt.s32.totalorder %s1150_s22, %s1146_s13 }
  0x24   : > { %417 = vperm.xlu2 %1125, %v378_v23  }
  0x25   : > { %p1148_p12 = pnand %p1147_p11, %p1285_p5  ;;  %p1153_p2 = por %p1152_p1, %p1151_p0 }
  0x27   : > { %1020 = vmatmul.msk.f32.gmra.mxu0 %vm489_vm1, %v358_v10  ;;  %1033 = vmatmul.msk.f32.gmra.mxu3 %vm489_vm1, %v371_v19  ;;  %p1149_p13 = pneg %p1148_p12 }
  0x28   : > { %422 = vperm.xlu0 %1123, %v379_v11   ;;  %427 = vperm.xlu1 %1124, %v380_v12  }
  0x29   : > { %p1154_p3 = pnand %p1153_p2, %p1149_p13 }
  0x2c   : > { %452 = vperm.xlu2 %1125, %v385_v25  }
  0x2f   : > { %1021 = vmatmul.msk.f32.gmra.mxu0 %vm489_vm1, %v359_v13 }
  0x30   : > { %432 = vperm.xlu0 %1123, %v381_v14   ;;  %457 = vperm.xlu1 %1124, %v386_v15  }
  0x34   : > { %437 = vperm.xlu2 %1125, %v382_v27  }
  0x37   : > { %1022 = vmatmul.msk.f32.gmra.mxu0 %vm489_vm1, %v360_v16 }
  0x38   : > { %462 = vperm.xlu0 %1123, %v387_v17   ;;  %442 = vperm.xlu1 %1124, %v383_v18  }
  0x3c   : > { %467 = vperm.xlu2 %1125, %v388_v29  }
  0x3f   : > { %1023 = vmatmul.msk.f32.gmra.mxu0 %vm489_vm1, %v361_v21 }
  0x40   : > { %447 = vperm.xlu0 %1123, %v384_v22  }
  0x47   : > { %1024 = vmatmul.msk.f32.gmra.mxu0 %vm489_vm1, %v362_v24 }
  0x4f   : > { %1025 = vmatmul.msk.f32.gmra.mxu0 %vm489_vm1, %v363_v26 }
  0x57   : > { %1026 = vmatmul.msk.f32.gmra.mxu0 %vm489_vm1, %v364_v28 }
  0x5f   : > { %1027 = vmatmul.msk.f32.gmra.mxu0 %vm489_vm1, %v365_v30 }
  0x67   : > { %1028 = vmatmul.msk.f32.gmra.mxu0 %vm489_vm1, %v366_v31 }
  0x6f   : > { %1029 = vmatmul.msk.f32.gmra.mxu0 %vm489_vm1, %v367_v32 }
  0x76   : > { %v413_v61 = vpop.permute.xlu2 %412 }
  0x77   : > { %1030 = vmatmul.msk.f32.gmra.mxu0 %vm489_vm1, %v368_v34  ;;  %v477_v1 = vmul.f32 %v1372_v38, %v413_v61 }
  0x7e   : > { %v418_v4 = vpop.permute.xlu2 %417 }
  0x7f   : > { %v478_v7 = vmul.f32 %v1372_v38, %v418_v4 }
  0x86   : > { %v453_v23 = vpop.permute.xlu2 %452 }
  0x8a   : > { %v393_v39 = vpop.permute.xlu0 %392  ;;  %v403_v49 = vpop.permute.xlu1 %402 }
  0x8b   : > { %v473_v40 = vmul.f32 %v1372_v38, %v393_v39  ;;  %v475_v53 = vmul.f32 %v1372_v38, %v403_v49 }
  0x8e   : > { %v438_v32 = vpop.permute.xlu2 %437 }
  0x8f   : > { %v482_v33 = vmul.f32 %v1372_v38, %v438_v32 }
  0x92   : > { %v398_v45 = vpop.permute.xlu0 %397  ;;  %v408_v56 = vpop.permute.xlu1 %407 }
  0x93   : > { %v474_v47 = vmul.f32 %v1372_v38, %v398_v45  ;;  %v476_v59 = vmul.f32 %v1372_v38, %v408_v56 }
  0x94   : > { %v559_v42 = vpop.f32.mrf.mxu0 }
  0x95   : > { %v560_v43 = vadd.f32 %v559_v42, %v473_v40 }
  0x97   : > { %v611_v44 = vadd.f32 %v1378_v41, %v560_v43 }
  0x99   : > { %v627_v46 = vmax.f32 %v611_v44, 0.0 }
  0x9a   : > { %v423_v12 = vpop.permute.xlu0 %422  ;;  %v428_v18 = vpop.permute.xlu1 %427 }
  0x9b   : > { %1034 = vmatmul.msk.f32.vlgmr.msra.gmra.mxu1 %vm651_vm2, %v627_v46  ;;  %v479_v13 = vmul.f32 %v1372_v38, %v423_v12  ;;  %v480_v19 = vmul.f32 %v1372_v38, %v428_v18 }
  0x9c   : > { %v562_v48 = vpop.f32.mrf.mxu0 }
  0x9d   : > { %v563_v50 = vadd.f32 %v562_v48, %v474_v47 }
  0x9f   : > { %v612_v51 = vadd.f32 %v1378_v41, %v563_v50 }
  0xa1   : > { %v628_v52 = vmax.f32 %v612_v51, 0.0 }
  0xa2   : > { %v433_v25 = vpop.permute.xlu0 %432  ;;  %v458_v29 = vpop.permute.xlu1 %457 }
  0xa3   : > { %1035 = vmatmul.msk.f32.gmra.mxu1 %vm651_vm2, %v628_v52  ;;  %v481_v26 = vmul.f32 %v1372_v38, %v433_v25 }
  0xa4   : > { %v565_v54 = vpop.f32.mrf.mxu0 }
  0xa5   : > { %v566_v55 = vadd.f32 %v565_v54, %v475_v53  ;;  %v485_v53 = vmul.f32 %v1372_v38, %v453_v23  ;;  %v784_v54 = vld [vmem:[%s1523_s7 + $0x18] sm:$0xff] }
  0xa6   : > { %849 = vmatpush.msra.mxu2 %v784_v54  ;;  %1077 = vmatpush.msra.mxu3 %v784_v54 }
  0xa7   : > { %v613_v57 = vadd.f32 %v1378_v41, %v566_v55  ;;  %v598_v55 = vpop.f32.mrf.mxu3 }
  0xa9   : > { %v629_v58 = vmax.f32 %v613_v57, 0.0  ;;  %v486_v57 = vmul.f32 %v1372_v38, %v458_v29 }
  0xaa   : > { %v463_v36 = vpop.permute.xlu0 %462  ;;  %v443_v39 = vpop.permute.xlu1 %442 }
  0xab   : > { %1036 = vmatmul.msk.f32.gmra.mxu1 %vm651_vm2, %v629_v58  ;;  %v483_v42 = vmul.f32 %v1372_v38, %v443_v39  ;;  %v599_v61 = vadd.f32 %v598_v55, %v486_v57 }
  0xac   : > { %v568_v60 = vpop.f32.mrf.mxu0 }
  0xad   : > { %v569_v62 = vadd.f32 %v568_v60, %v476_v59  ;;  %v783_v60 = vld [vmem:[%s1523_s7 + $0x10] sm:$0xff] }
  0xae   : > { %850 = vmatpush.msra.mxu2 %v783_v60  ;;  %1078 = vmatpush.msra.mxu3 %v783_v60 }
  0xaf   : > { %v614_v63 = vadd.f32 %v1378_v41, %v569_v62 }
  0xb1   : > { %v630_v0 = vmax.f32 %v614_v63, 0.0  ;;  %v782_v63 = vld [vmem:[%s1523_s7 + $0x8] sm:$0xff] }
  0xb2   : > { %v448_v46 = vpop.permute.xlu0 %447  ;;  %851 = vmatpush.msra.mxu2 %v782_v63  ;;  %1079 = vmatpush.msra.mxu3 %v782_v63  ;;  %v1129_v63 = vld [vmem:[%s1524_s8] ss:$0 sm:$0xff] }
  0xb3   : > { %1037 = vmatmul.msk.f32.gmra.mxu1 %vm651_vm2, %v630_v0  ;;  %v484_v48 = vmul.f32 %v1372_v38, %v448_v46  ;;  %v781_v0 = vld [vmem:[%s1523_s7] sm:$0xff] }
  0xb4   : > { %v571_v2 = vpop.f32.mrf.mxu0  ;;  %852 = vmatpush.msra.mxu2 %v781_v0  ;;  %1080 = vmatpush.msra.mxu3 %v781_v0 }
  0xb5   : > { %v572_v3 = vadd.f32 %v571_v2, %v477_v1  ;;  %v487_v1 = vmul.f32 %v1372_v38, %v463_v36  ;;  %v624_v2 = vadd.f32 %v1378_v41, %v599_v61 }
  0xb7   : > { %v615_v5 = vadd.f32 %v1378_v41, %v572_v3  ;;  %v601_v3 = vpop.f32.mrf.mxu3 }
  0xb8   : > { %v602_v4 = vadd.f32 %v601_v3, %v487_v1 }
  0xb9   : > { %v631_v6 = vmax.f32 %v615_v5, 0.0  ;;  %v640_v5 = vmax.f32 %v624_v2, 0.0 }
  0xbb   : > { %1038 = vmatmul.msk.f32.gmra.mxu1 %vm651_vm2, %v631_v6  ;;  %v468_v6 = vpop.permute.xlu2 %467 }
  0xbc   : > { %v574_v8 = vpop.f32.mrf.mxu0 }
  0xbd   : > { %v575_v9 = vadd.f32 %v574_v8, %v478_v7  ;;  %v625_v7 = vadd.f32 %v1378_v41, %v602_v4  ;;  %v488_v8 = vmul.f32 %v1372_v38, %v468_v6 }
  0xbf   : > { %v616_v10 = vadd.f32 %v1378_v41, %v575_v9  ;;  %v604_v9 = vpop.f32.mrf.mxu3 }
  0xc1   : > { %v632_v11 = vmax.f32 %v616_v10, 0.0  ;;  %v641_v10 = vmax.f32 %v625_v7, 0.0 }
  0xc3   : > { %1039 = vmatmul.msk.f32.gmra.mxu1 %vm651_vm2, %v632_v11  ;;  %v605_v11 = vadd.f32 %v604_v9, %v488_v8 }
  0xc4   : > { %v577_v14 = vpop.f32.mrf.mxu0 }
  0xc5   : > { %v578_v15 = vadd.f32 %v577_v14, %v479_v13  ;;  %v626_v12 = vadd.f32 %v1378_v41, %v605_v11  ;;  %v1128_v14 = vld [vmem:[%s1522_s6] ss:$0 sm:$0xff] }
  0xc7   : > { %v617_v16 = vadd.f32 %v1378_v41, %v578_v15  ;;  %v642_v13 = vmax.f32 %v626_v12, 0.0 }
  0xc9   : > { %v633_v17 = vmax.f32 %v617_v16, 0.0 }
  0xcb   : > { %1040 = vmatmul.msk.f32.gmra.mxu1 %vm651_vm2, %v633_v17 }
  0xcc   : > { %v580_v20 = vpop.f32.mrf.mxu0 }
  0xcd   : > { %v581_v21 = vadd.f32 %v580_v20, %v480_v19 }
  0xcf   : > { %v618_v22 = vadd.f32 %v1378_v41, %v581_v21 }
  0xd1   : > { %v634_v24 = vmax.f32 %v618_v22, 0.0 }
  0xd3   : > { %1041 = vmatmul.msk.f32.gmra.mxu1 %vm651_vm2, %v634_v24 }
  0xd4   : > { %v583_v27 = vpop.f32.mrf.mxu0 }
  0xd5   : > { %v584_v28 = vadd.f32 %v583_v27, %v481_v26 }
  0xd7   : > { %v619_v30 = vadd.f32 %v1378_v41, %v584_v28 }
  0xd9   : > { %v635_v31 = vmax.f32 %v619_v30, 0.0 }
  0xdb   : > { %1042 = vmatmul.msk.f32.gmra.mxu1 %vm651_vm2, %v635_v31 }
  0xdc   : > { %v586_v34 = vpop.f32.mrf.mxu0 }
  0xdd   : > { %v587_v35 = vadd.f32 %v586_v34, %v482_v33 }
  0xdf   : > { %v620_v37 = vadd.f32 %v1378_v41, %v587_v35 }
  0xe1   : > { %v636_v40 = vmax.f32 %v620_v37, 0.0 }
  0xe3   : > { %1043 = vmatmul.msk.f32.gmra.mxu1 %vm651_vm2, %v636_v40 }
  0xe4   : > { %v589_v43 = vpop.f32.mrf.mxu0 }
  0xe5   : > { %v590_v44 = vadd.f32 %v589_v43, %v483_v42 }
  0xe7   : > { %v621_v45 = vadd.f32 %v1378_v41, %v590_v44 }
  0xe9   : > { %v637_v47 = vmax.f32 %v621_v45, 0.0 }
  0xeb   : > { %1044 = vmatmul.msk.f32.gmra.mxu1 %vm651_vm2, %v637_v47 }
  0xec   : > { %v592_v49 = vpop.f32.mrf.mxu0 }
  0xed   : > { %v593_v50 = vadd.f32 %v592_v49, %v484_v48 }
  0xef   : > { %v622_v51 = vadd.f32 %v1378_v41, %v593_v50 }
  0xf1   : > { %v638_v52 = vmax.f32 %v622_v51, 0.0 }
  0xf3   : > { %1045 = vmatmul.msk.f32.gmra.mxu1 %vm651_vm2, %v638_v52 }
  0xf4   : > { %v595_v56 = vpop.f32.mrf.mxu0 }
  0xf5   : > { %v596_v58 = vadd.f32 %v595_v56, %v485_v53 }
  0xf7   : > { %v623_v59 = vadd.f32 %v1378_v41, %v596_v58 }
  0xf9   : > { %v639_v62 = vmax.f32 %v623_v59, 0.0 }
  0xfb   : > { %1046 = vmatmul.msk.f32.vlgmr.msrb.gmra.mxu3 %vm651_vm2, %v639_v62 }
 0x103   : > { %1047 = vmatmul.msk.f32.gmra.mxu3 %vm651_vm2, %v640_v5 }
 0x10b   : > { %1048 = vmatmul.msk.f32.gmra.mxu3 %vm651_vm2, %v641_v10 }
 0x113   : > { %1049 = vmatmul.msk.f32.gmra.mxu3 %vm651_vm2, %v642_v13 }
 0x118   : > { %v717_v15 = vpop.f32.mrf.mxu1 }
 0x119   : > { %v718_v16 = vadd.f32 %v1128_v14, %v717_v15 }
 0x11b   : > { %v765_v17 = vmax.f32 %v718_v16, 0.0 }
 0x11d   : > { %1050 = vmatmul.msk.f32.vlgmr.msra.gmra.mxu2 %vm651_vm2, %v765_v17 }
 0x120   : > { %v720_v38 = vpop.f32.mrf.mxu1 }
 0x121   : > { %v721_v18 = vadd.f32 %v1128_v14, %v720_v38 }
 0x123   : > { %v766_v19 = vmax.f32 %v721_v18, 0.0 }
 0x125   : > { %1051 = vmatmul.msk.f32.gmra.mxu2 %vm651_vm2, %v766_v19 }
 0x128   : > { %v723_v20 = vpop.f32.mrf.mxu1 }
 0x129   : > { %v724_v21 = vadd.f32 %v1128_v14, %v723_v20 }
 0x12b   : > { %v767_v41 = vmax.f32 %v724_v21, 0.0 }
 0x12d   : > { %1052 = vmatmul.msk.f32.gmra.mxu2 %vm651_vm2, %v767_v41 }
 0x130   : > { %v726_v22 = vpop.f32.mrf.mxu1 }
 0x131   : > { %v727_v23 = vadd.f32 %v1128_v14, %v726_v22 }
 0x133   : > { %v768_v24 = vmax.f32 %v727_v23, 0.0 }
 0x135   : > { %1053 = vmatmul.msk.f32.gmra.mxu2 %vm651_vm2, %v768_v24 }
 0x138   : > { %v729_v25 = vpop.f32.mrf.mxu1 }
 0x139   : > { %v730_v26 = vadd.f32 %v1128_v14, %v729_v25 }
 0x13b   : > { %v769_v27 = vmax.f32 %v730_v26, 0.0 }
 0x13d   : > { %1054 = vmatmul.msk.f32.gmra.mxu2 %vm651_vm2, %v769_v27 }
 0x140   : > { %v732_v28 = vpop.f32.mrf.mxu1 }
 0x141   : > { %v733_v29 = vadd.f32 %v1128_v14, %v732_v28 }
 0x143   : > { %v770_v30 = vmax.f32 %v733_v29, 0.0 }
 0x145   : > { %1055 = vmatmul.msk.f32.gmra.mxu2 %vm651_vm2, %v770_v30 }
 0x148   : > { %v735_v31 = vpop.f32.mrf.mxu1 }
 0x149   : > { %v736_v32 = vadd.f32 %v1128_v14, %v735_v31 }
 0x14b   : > { %v771_v33 = vmax.f32 %v736_v32, 0.0 }
 0x14d   : > { %1056 = vmatmul.msk.f32.gmra.mxu2 %vm651_vm2, %v771_v33 }
 0x150   : > { %v738_v34 = vpop.f32.mrf.mxu1 }
 0x151   : > { %v739_v35 = vadd.f32 %v1128_v14, %v738_v34 }
 0x153   : > { %v772_v36 = vmax.f32 %v739_v35, 0.0 }
 0x155   : > { %1057 = vmatmul.msk.f32.gmra.mxu2 %vm651_vm2, %v772_v36 }
 0x158   : > { %v741_v37 = vpop.f32.mrf.mxu1 }
 0x159   : > { %v742_v39 = vadd.f32 %v1128_v14, %v741_v37 }
 0x15b   : > { %v773_v40 = vmax.f32 %v742_v39, 0.0 }
 0x15d   : > { %1058 = vmatmul.msk.f32.gmra.mxu2 %vm651_vm2, %v773_v40 }
 0x160   : > { %v744_v42 = vpop.f32.mrf.mxu1 }
 0x161   : > { %v745_v43 = vadd.f32 %v1128_v14, %v744_v42 }
 0x163   : > { %v774_v44 = vmax.f32 %v745_v43, 0.0 }
 0x165   : > { %1059 = vmatmul.msk.f32.gmra.mxu2 %vm651_vm2, %v774_v44 }
 0x168   : > { %v747_v45 = vpop.f32.mrf.mxu1 }
 0x169   : > { %v748_v46 = vadd.f32 %v1128_v14, %v747_v45 }
 0x16b   : > { %v775_v47 = vmax.f32 %v748_v46, 0.0 }
 0x16d   : > { %1060 = vmatmul.msk.f32.gmra.mxu2 %vm651_vm2, %v775_v47 }
 0x170   : > { %v750_v48 = vpop.f32.mrf.mxu1 }
 0x171   : > { %v751_v49 = vadd.f32 %v1128_v14, %v750_v48 }
 0x173   : > { %v776_v50 = vmax.f32 %v751_v49, 0.0 }
 0x175   : > { %1061 = vmatmul.msk.f32.gmra.mxu2 %vm651_vm2, %v776_v50 }
 0x17e   : > { %v753_v51 = vpop.f32.mrf.mxu3 }
 0x17f   : > { %v754_v52 = vadd.f32 %v1128_v14, %v753_v51 }
 0x181   : > { %v777_v53 = vmax.f32 %v754_v52, 0.0 }
 0x183   : > { %1062 = vmatmul.msk.f32.vlgmr.msra.gmra.mxu3 %vm651_vm2, %v777_v53 }
 0x186   : > { %v756_v54 = vpop.f32.mrf.mxu3 }
 0x187   : > { %v757_v55 = vadd.f32 %v1128_v14, %v756_v54 }
 0x189   : > { %v778_v56 = vmax.f32 %v757_v55, 0.0 }
 0x18b   : > { %1063 = vmatmul.msk.f32.gmra.mxu3 %vm651_vm2, %v778_v56 }
 0x18e   : > { %v759_v57 = vpop.f32.mrf.mxu3 }
 0x18f   : > { %v760_v58 = vadd.f32 %v1128_v14, %v759_v57 }
 0x191   : > { %v779_v59 = vmax.f32 %v760_v58, 0.0 }
 0x193   : > { %1064 = vmatmul.msk.f32.gmra.mxu3 %vm651_vm2, %v779_v59 }
 0x196   : > { %v762_v60 = vpop.f32.mrf.mxu3 }
 0x197   : > { %v763_v61 = vadd.f32 %v1128_v14, %v762_v60 }
 0x199   : > { %v780_v62 = vmax.f32 %v763_v61, 0.0 }
 0x19b   : > { %1065 = vmatmul.msk.f32.gmra.mxu3 %vm651_vm2, %v780_v62 }
 0x1a0   : > { %v854_v0 = vpop.f32.mrf.mxu2 }
 0x1a1   : > { %v855_v1 = vadd.f32 %v1129_v63, %v854_v0 }
 0x1a3   : > { %902 = vst [vmem:[%s1464_s21] sm:$0xff] %v855_v1 }
 0x1a8   : > { %v857_v2 = vpop.f32.mrf.mxu2 }
 0x1a9   : > { %v858_v3 = vadd.f32 %v1129_v63, %v857_v2 }
 0x1ab   : > { %903 = vst [vmem:[%s1464_s21 + $0x8] sm:$0xff] %v858_v3 }
 0x1b0   : > { %v860_v4 = vpop.f32.mrf.mxu2 }
 0x1b1   : > { %v861_v5 = vadd.f32 %v1129_v63, %v860_v4 }
 0x1b3   : > { %904 = vst [vmem:[%s1464_s21 + $0x10] sm:$0xff] %v861_v5 }
 0x1b8   : > { %v863_v6 = vpop.f32.mrf.mxu2 }
 0x1b9   : > { %v864_v7 = vadd.f32 %v1129_v63, %v863_v6 }
 0x1bb   : > { %905 = vst [vmem:[%s1464_s21 + $0x18] sm:$0xff] %v864_v7 }
 0x1c0   : > { %v866_v8 = vpop.f32.mrf.mxu2 }
 0x1c1   : > { %v867_v9 = vadd.f32 %v1129_v63, %v866_v8 }
 0x1c3   : > { %906 = vst [vmem:[%s1464_s21 + $0x20] sm:$0xff] %v867_v9 }
 0x1c8   : > { %v869_v10 = vpop.f32.mrf.mxu2 }
 0x1c9   : > { %v870_v11 = vadd.f32 %v1129_v63, %v869_v10 }
 0x1cb   : > { %907 = vst [vmem:[%s1464_s21 + $0x28] sm:$0xff] %v870_v11 }
 0x1d0   : > { %v872_v12 = vpop.f32.mrf.mxu2 }
 0x1d1   : > { %v873_v13 = vadd.f32 %v1129_v63, %v872_v12 }
 0x1d3   : > { %908 = vst [vmem:[%s1464_s21 + $0x30] sm:$0xff] %v873_v13 }
 0x1d8   : > { %v875_v14 = vpop.f32.mrf.mxu2 }
 0x1d9   : > { %v876_v15 = vadd.f32 %v1129_v63, %v875_v14 }
 0x1db   : > { %909 = vst [vmem:[%s1464_s21 + $0x38] sm:$0xff] %v876_v15 }
 0x1e0   : > { %v878_v16 = vpop.f32.mrf.mxu2 }
 0x1e1   : > { %v879_v17 = vadd.f32 %v1129_v63, %v878_v16 }
 0x1e3   : > { %910 = vst [vmem:[%s1464_s21 + $0x40] sm:$0xff] %v879_v17 }
 0x1e8   : > { %v881_v38 = vpop.f32.mrf.mxu2 }
 0x1e9   : > { %v882_v18 = vadd.f32 %v1129_v63, %v881_v38 }
 0x1eb   : > { %911 = vst [vmem:[%s1464_s21 + $0x48] sm:$0xff] %v882_v18 }
 0x1f0   : > { %v884_v19 = vpop.f32.mrf.mxu2 }
 0x1f1   : > { %v885_v20 = vadd.f32 %v1129_v63, %v884_v19 }
 0x1f3   : > { %912 = vst [vmem:[%s1464_s21 + $0x50] sm:$0xff] %v885_v20 }
 0x1f8   : > { %v887_v21 = vpop.f32.mrf.mxu2 }
 0x1f9   : > { %v888_v41 = vadd.f32 %v1129_v63, %v887_v21 }
 0x1fb   : > { %913 = vst [vmem:[%s1464_s21 + $0x58] sm:$0xff] %v888_v41 }
 0x206   : > { %v890_v22 = vpop.f32.mrf.mxu3 }
 0x207   : > { %v891_v23 = vadd.f32 %v1129_v63, %v890_v22 }
 0x209   : > { %914 = vst [vmem:[%s1464_s21 + $0x60] sm:$0xff] %v891_v23 }
 0x20e   : > { %v893_v24 = vpop.f32.mrf.mxu3 }
 0x20f   : > { %v894_v25 = vadd.f32 %v1129_v63, %v893_v24 }
 0x211   : > { %915 = vst [vmem:[%s1464_s21 + $0x68] sm:$0xff] %v894_v25 }
 0x216   : > { %v896_v26 = vpop.f32.mrf.mxu3 }
 0x217   : > { %v897_v27 = vadd.f32 %v1129_v63, %v896_v26 }
 0x219   : > { %916 = vst [vmem:[%s1464_s21 + $0x70] sm:$0xff] %v897_v27 }
 0x21e   : > { %v899_v28 = vpop.f32.mrf.mxu3 }
 0x21f   : > { %v900_v29 = vadd.f32 %v1129_v63, %v899_v28 }
 0x221   : > { %917 = vst [vmem:[%s1464_s21 + $0x78] sm:$0xff] %v900_v29 }
 0x222   : > { %1157 = shalt.err (!%p1154_p3)
}
 0x223   : > { %s1195_s29 = smov 128   ;;  %s1196_s21 = smov 8  }
 0x224   : > { %1081 = dma.vmem_to_hbm [thread:$0]  (%p1285_p5), %s932_s26, 2048, %s934_s27, %s919_s28, %s1195_s29, %s1195_s29, %s1196_s21  }
 0x225 PF: > { %p1087_p4 = scmp.ge.s32.totalorder %s1192_s12, 2  ;;  %s948_s25 = sand.u32 1, %s1180_s30  }
 0x226   : > { %s949_s16 = scalar_lea.sflag [#allocation3], %s948_s25 }
 0x227   : > { %p1084_p7 = pnand %p1087_p4, %p1289_p6 }
 0x229   : > { %p1085_p8 = pneg %p1084_p7 }
 0x22b   : > { %1175 = dma.done.wait (%p1085_p8), %s949_s16, 2048  }
 0x22c   : > { %1177 = vsyncadd (%p1085_p8), %s949_s16, 4294965248  ;;  %p19_p9 = scmp.ge.s32.totalorder %s1272_s15, 4   ;;  %s1528_s30 = smov %s1184_s10 }
 0x22d   : > { %s1529_s10 = smov %s1188_s11  ;;  %s1530_s11 = smov %s1283_s18 }
 0x22e   : > { %s1531_s12 = smov %s1272_s15  ;;  %21 = sbr.rel (!%p19_p9) target bundleno = 3 (0x3), region = 94 }
 0x233   :  { %955 = vsyncpa [#allocation3], 1 }
 0x234   :  { %957 = vsyncpa [#allocation3 + $0x1], 1 }

</bundles_post_ra>
